<compile_context>
chip_gen: v7x
topology: tpu7x:2x2x1
jax: 0.10.0
libtpu: 0.0.40
codegen_flags: <defaults>
</compile_context>

<pallas_src>
import functools

import jax
import jax.numpy as jnp
from jax.experimental import pallas as pl
from jax.experimental.pallas import tpu as pltpu


def _ce2d_kernel(x_ref, t_ref, o_ref, *, hw, tl, n_j, full_tiles):
    p = pl.program_id(1)
    j = pl.program_id(2)
    gi = p * n_j + j                      # global pixel-tile index

    @pl.when(j == 0)
    def _():
        o_ref[...] = jnp.zeros_like(o_ref)

    x = x_ref[0].astype(jnp.float32)      # (C, TL) logits, classes on sublanes
    t = t_ref[0].astype(jnp.int32)        # (1, TL) target class ids

    # log-sum-exp over the class (sublane) axis, independently per pixel lane.
    m = jnp.max(x, axis=0, keepdims=True)                                # (1, TL)
    lse = jnp.log(jnp.sum(jnp.exp(x - m), axis=0, keepdims=True)) + m    # (1, TL)

    # Target-class logit via one-hot select (no full logp tile materialized).
    class_iota = jax.lax.broadcasted_iota(jnp.int32, x.shape, 0)         # (C, TL)
    picked_logit = jnp.sum(jnp.where(class_iota == t, x, 0.0),
                           axis=0, keepdims=True)                        # (1, TL)
    nll = lse - picked_logit                                             # (1, TL)

    # Hot path: tile fully inside H*W -> plain accumulate, no masking VPU work.
    @pl.when(gi < full_tiles)
    def _():
        o_ref[...] += nll[None]                                          # (1,1,TL)

    # Cold path: the single ragged tail tile (and any clamped tiles of the P
    # split) — mask by global pixel position so padded/garbage lanes add zero.
    @pl.when(gi >= full_tiles)
    def _():
        lane = jax.lax.broadcasted_iota(jnp.int32, (1, tl), 1)
        valid = (gi * tl + lane) < hw
        o_ref[...] += jnp.where(valid, nll, 0.0)[None]


def cross_entropy_loss_2d(inputs, targets, *, tl=None):
    """inputs: (N, C, H, W) float; targets: (N, H, W) int. Returns scalar mean NLL."""
    N, C, H, W = inputs.shape
    HW = H * W

    # Free views — no transpose / pad / dtype-cast passes over HBM.
    x = inputs.reshape(N, C, HW)
    t = targets.reshape(N, 1, HW)          # integer labels; widened in-kernel

    # --- Padded, double-buffered VMEM cost per pixel lane -------------------
    bytes_x = jnp.dtype(inputs.dtype).itemsize
    sub_mult = max(8, 32 // max(bytes_x, 1))          # f32->8, bf16->16, int8->32
    c_pad = pl.cdiv(C, sub_mult) * sub_mult
    # x tile: c_pad sublanes * bytes_x ; target tile: 1->8 sublanes of int32
    # (32 B/lane, same for int8 via 1->32 packing); output accumulator tile:
    # 1->8 sublanes of f32 (32 B/lane). All double-buffered.
    per_lane = 2 * (c_pad * bytes_x + 32 + 32)

    # --- Generation-aware VMEM budget (v7x has 64 MiB, v5e/v6e 128 MiB) -----
    try:
        vmem_bytes = pltpu.get_tpu_info().vmem_capacity_bytes
    except Exception:
        vmem_bytes = 64 * 1024 * 1024                 # conservative (v7x-sized)
    budget = min(int(vmem_bytes * 0.6), 96 * 1024 * 1024)
    vmem_limit = min(int(vmem_bytes * 0.75), 112 * 1024 * 1024)

    if tl is None:
        tl = max(128, (budget // per_lane) // 128 * 128)
        tl = min(tl, 128 * 1024)                      # raised cap (was 16384)
    tl = min(tl, pl.cdiv(HW, 128) * 128)              # don't exceed rounded-up HW

    n_total = pl.cdiv(HW, tl)                         # pixel tiles overall
    full_tiles = HW // tl                             # tiles with no ragged tail
    # Second 'parallel' axis: when N is odd (notably N == 1) split the pixel
    # range in two so both v7x TensorCores get work; no-op on v5e/v6e.
    P = 2 if (N % 2 == 1 and n_total >= 2) else 1
    n_j = pl.cdiv(n_total, P)
    last_blk = n_total - 1

    def in_map(n, p, j):
        # Clamp so wholly-OOB tiles of the P split re-read an existing block
        # (their contribution is zeroed by the lane mask in the kernel).
        return (n, 0, jnp.minimum(p * n_j + j, last_blk))

    kernel = functools.partial(_ce2d_kernel, hw=HW, tl=tl, n_j=n_j,
                               full_tiles=full_tiles)

    partials = pl.pallas_call(
        kernel,
        out_shape=jax.ShapeDtypeStruct((N, P, tl), jnp.float32),
        grid_spec=pltpu.PrefetchScalarGridSpec(
            num_scalar_prefetch=0,
            grid=(N, P, n_j),
            in_specs=[
                pl.BlockSpec((1, C, tl), in_map),
                pl.BlockSpec((1, 1, tl), in_map),
            ],
            out_specs=pl.BlockSpec((1, 1, tl), lambda n, p, j: (n, p, 0)),
        ),
        compiler_params=pltpu.CompilerParams(
            dimension_semantics=("parallel", "parallel", "arbitrary"),
            vmem_limit_bytes=vmem_limit,
        ),
    )(x, t)

    # TODO(synk): ignore_index (-100) and per-class weights of NLLLoss2d are not
    # implemented (module uses the defaults: weight=None, size_average=True).
    # Tiny final reduction + size_average normalization in plain JAX.
    return jnp.sum(partials) / jnp.float32(N * HW)


if __name__ == "__main__":
    key = jax.random.PRNGKey(0)
    k1, k2 = jax.random.split(key)

    N, C, H, W = 2, 4, 16, 16
    inputs = jax.random.normal(k1, (N, C, H, W), dtype=jnp.float32)
    targets = jax.random.randint(k2, (N, H, W), 0, C, dtype=jnp.int32)

    loss = jax.block_until_ready(cross_entropy_loss_2d(inputs, targets))

    # Reference check in plain JAX (log_softmax over class dim + mean NLL).
    logp = jax.nn.log_softmax(inputs, axis=1)                       # (N, C, H, W)
    ref = -jnp.mean(
        jnp.take_along_axis(logp, targets[:, None, :, :], axis=1)[:, 0]
    )
    assert jnp.allclose(loss, ref, atol=1e-5, rtol=1e-5), (loss, ref)

    print("KERNEL_OK")
</pallas_src>

<mosaic_0001>
module attributes {stable_mosaic.version = 11 : i64} {
  func.func @_ce2d_kernel(%arg0: i32, %arg1: i32, %arg2: i32, %arg3: memref<1x4x256xf32, #tpu.memory_space<vmem>>, %arg4: memref<1x1x256xi32, #tpu.memory_space<vmem>>, %arg5: memref<1x1x256xf32, #tpu.memory_space<vmem>>) attributes {dimension_semantics = [#tpu.dimension_semantics<parallel>, #tpu.dimension_semantics<parallel>, #tpu.dimension_semantics<arbitrary>], iteration_bounds = array<i64: 2, 1, 1>, scalar_prefetch = 0 : i64, scratch_operands = 0 : i64, tpu.core_type = #tpu.core_type<tc>, window_params = [{transform_indices = @transform_0, window_bounds = array<i64: 1, 4, 256>}, {transform_indices = @transform_1, window_bounds = array<i64: 1, 1, 256>}, {transform_indices = @transform_2, window_bounds = array<i64: 1, 1, 256>}]} {
    %c1_i32 = arith.constant 1 : i32
    %0 = arith.muli %arg1, %c1_i32 : i32
    %1 = arith.addi %0, %arg2 : i32
    %c0_i32 = arith.constant 0 : i32
    %2 = arith.cmpi eq, %arg2, %c0_i32 : i32
    %3 = arith.extui %2 : i1 to i32
    %c0_i32_0 = arith.constant 0 : i32
    %4 = arith.cmpi ne, %3, %c0_i32_0 : i32
    scf.if %4 {
      %cst_13 = arith.constant 0.000000e+00 : f32
      %32 = vector.broadcast %cst_13 : f32 to vector<1x1x256xf32>
      %c0_14 = arith.constant 0 : index
      %c0_15 = arith.constant 0 : index
      %c0_16 = arith.constant 0 : index
      %33 = vector.load %arg5[%c0_14, %c0_15, %c0_16] : memref<1x1x256xf32, #tpu.memory_space<vmem>>, vector<1x1x256xf32>
      tpu.vector_store %arg5[%c0_14, %c0_15, %c0_16], %32 {strides = array<i32>} : memref<1x1x256xf32, #tpu.memory_space<vmem>>, vector<1x1x256xf32>,
    } else {
    }
    %c0 = arith.constant 0 : index
    %c0_1 = arith.constant 0 : index
    %c0_2 = arith.constant 0 : index
    %5 = vector.load %arg3[%c0, %c0_1, %c0_2] : memref<1x4x256xf32, #tpu.memory_space<vmem>>, vector<1x4x256xf32>
    %6 = vector.shape_cast %5 : vector<1x4x256xf32> to vector<4x256xf32>
    %c0_3 = arith.constant 0 : index
    %c0_4 = arith.constant 0 : index
    %c0_5 = arith.constant 0 : index
    %7 = vector.load %arg4[%c0_3, %c0_4, %c0_5] : memref<1x1x256xi32, #tpu.memory_space<vmem>>, vector<1x1x256xi32>
    %8 = vector.shape_cast %7 : vector<1x1x256xi32> to vector<1x256xi32>
    %cst = arith.constant dense<0xFF800000> : vector<256xf32>
    %9 = vector.multi_reduction <maximumf>, %6, %cst [0] : vector<4x256xf32> to vector<256xf32>
    %10 = vector.shape_cast %9 : vector<256xf32> to vector<1x256xf32>
    %11 = vector.broadcast %10 : vector<1x256xf32> to vector<4x256xf32>
    %12 = arith.subf %6, %11 : vector<4x256xf32>
    %13 = math.exp %12 : vector<4x256xf32>
    %cst_6 = arith.constant dense<0.000000e+00> : vector<256xf32>
    %14 = vector.multi_reduction <add>, %13, %cst_6 [0] : vector<4x256xf32> to vector<256xf32>
    %15 = vector.shape_cast %14 : vector<256xf32> to vector<1x256xf32>
    %16 = math.log %15 : vector<1x256xf32>
    %17 = arith.addf %16, %10 : vector<1x256xf32>
    %18 = tpu.iota {dimensions = array<i32: 0>} : vector<4x256xi32>
    %19 = vector.broadcast %8 : vector<1x256xi32> to vector<4x256xi32>
    %20 = arith.cmpi eq, %18, %19 : vector<4x256xi32>
    %cst_7 = arith.constant 0.000000e+00 : f32
    %21 = vector.broadcast %cst_7 : f32 to vector<4x256xf32>
    %22 = arith.select %20, %6, %21 : vector<4x256xi1>, vector<4x256xf32>
    %cst_8 = arith.constant dense<0.000000e+00> : vector<256xf32>
    %23 = vector.multi_reduction <add>, %22, %cst_8 [0] : vector<4x256xf32> to vector<256xf32>
    %24 = vector.shape_cast %23 : vector<256xf32> to vector<1x256xf32>
    %25 = arith.subf %17, %24 : vector<1x256xf32>
    %c1_i32_9 = arith.constant 1 : i32
    %26 = arith.cmpi slt, %1, %c1_i32_9 : i32
    %27 = arith.extui %26 : i1 to i32
    %c0_i32_10 = arith.constant 0 : i32
    %28 = arith.cmpi ne, %27, %c0_i32_10 : i32
    scf.if %28 {
      %c0_13 = arith.constant 0 : index
      %c0_14 = arith.constant 0 : index
      %c0_15 = arith.constant 0 : index
      %32 = vector.load %arg5[%c0_13, %c0_14, %c0_15] : memref<1x1x256xf32, #tpu.memory_space<vmem>>, vector<1x1x256xf32>
      %33 = vector.shape_cast %25 : vector<1x256xf32> to vector<1x1x256xf32>
      %34 = arith.addf %32, %33 : vector<1x1x256xf32>
      %c0_16 = arith.constant 0 : index
      %c0_17 = arith.constant 0 : index
      %c0_18 = arith.constant 0 : index
      %35 = vector.load %arg5[%c0_16, %c0_17, %c0_18] : memref<1x1x256xf32, #tpu.memory_space<vmem>>, vector<1x1x256xf32>
      tpu.vector_store %arg5[%c0_16, %c0_17, %c0_18], %34 {strides = array<i32>} : memref<1x1x256xf32, #tpu.memory_space<vmem>>, vector<1x1x256xf32>,
    } else {
    }
    %c1_i32_11 = arith.constant 1 : i32
    %29 = arith.cmpi sge, %1, %c1_i32_11 : i32
    %30 = arith.extui %29 : i1 to i32
    %c0_i32_12 = arith.constant 0 : i32
    %31 = arith.cmpi ne, %30, %c0_i32_12 : i32
    scf.if %31 {
      %32 = tpu.iota {dimensions = array<i32: 1>} : vector<1x256xi32>
      %c256_i32 = arith.constant 256 : i32
      %33 = arith.muli %1, %c256_i32 : i32
      %34 = vector.broadcast %33 : i32 to vector<1x256xi32>
      %35 = arith.addi %34, %32 : vector<1x256xi32>
      %c256_i32_13 = arith.constant 256 : i32
      %36 = vector.broadcast %c256_i32_13 : i32 to vector<1x256xi32>
      %37 = arith.cmpi slt, %35, %36 : vector<1x256xi32>
      %c0_14 = arith.constant 0 : index
      %c0_15 = arith.constant 0 : index
      %c0_16 = arith.constant 0 : index
      %38 = vector.load %arg5[%c0_14, %c0_15, %c0_16] : memref<1x1x256xf32, #tpu.memory_space<vmem>>, vector<1x1x256xf32>
      %cst_17 = arith.constant 0.000000e+00 : f32
      %39 = vector.broadcast %cst_17 : f32 to vector<1x256xf32>
      %40 = arith.select %37, %25, %39 : vector<1x256xi1>, vector<1x256xf32>
      %41 = vector.shape_cast %40 : vector<1x256xf32> to vector<1x1x256xf32>
      %42 = arith.addf %38, %41 : vector<1x1x256xf32>
      %c0_18 = arith.constant 0 : index
      %c0_19 = arith.constant 0 : index
      %c0_20 = arith.constant 0 : index
      %43 = vector.load %arg5[%c0_18, %c0_19, %c0_20] : memref<1x1x256xf32, #tpu.memory_space<vmem>>, vector<1x1x256xf32>
      tpu.vector_store %arg5[%c0_18, %c0_19, %c0_20], %42 {strides = array<i32>} : memref<1x1x256xf32, #tpu.memory_space<vmem>>, vector<1x1x256xf32>,
    } else {
    }
    return
  }
  func.func @transform_0(%arg0: i32, %arg1: i32, %arg2: i32) -> (i32, i32, i32) {
    %c1_i32 = arith.constant 1 : i32
    %0 = arith.muli %arg1, %c1_i32 : i32
    %1 = arith.addi %0, %arg2 : i32
    %c0_i32 = arith.constant 0 : i32
    %2 = arith.minsi %1, %c0_i32 : i32
    %c0_i32_0 = arith.constant 0 : i32
    %c0_i32_1 = arith.constant 0 : i32
    return %arg0, %c0_i32_0, %2 : i32, i32, i32
  }
  func.func @transform_1(%arg0: i32, %arg1: i32, %arg2: i32) -> (i32, i32, i32) {
    %c1_i32 = arith.constant 1 : i32
    %0 = arith.muli %arg1, %c1_i32 : i32
    %1 = arith.addi %0, %arg2 : i32
    %c0_i32 = arith.constant 0 : i32
    %2 = arith.minsi %1, %c0_i32 : i32
    %c0_i32_0 = arith.constant 0 : i32
    %c0_i32_1 = arith.constant 0 : i32
    return %arg0, %c0_i32_0, %2 : i32, i32, i32
  }
  func.func @transform_2(%arg0: i32, %arg1: i32, %arg2: i32) -> (i32, i32, i32) {
    %c0_i32 = arith.constant 0 : i32
    %c0_i32_0 = arith.constant 0 : i32
    return %arg0, %arg1, %c0_i32 : i32, i32, i32
  }
}

</mosaic_0001>

<bundles_post_ra>
// kernel: tpu_custom_call.1
= control target key start
LH: loop header
LB: loop body
LE: loop exit
PB: predicated region body
PF: predicated region fallthrough
CT: control target
= control target key end

     0   :  { %7 = vsyncpa [#allocation3], 0  ;;  %s1043_s0 = inlined_call_operand.hbm [shape: f32[2,4,256], index: 0, kind: input, shape index: {}]   ;;  %s1044_s1 = inlined_call_operand.hbm [shape: s32[2,1,256], index: 1, kind: input, shape index: {}]   ;;  %s1045_s2 = inlined_call_operand.hbm [shape: f32[2,1,256], index: 2, kind: output, shape index: {}]  }
   0x1   :  { %9 = vsyncpa [#allocation3 + $0x1], 0 }
   0x2   :  { %10 = vsyncpa [#allocation6], 0 }
   0x3   :  { %12 = vsyncpa [#allocation6 + $0x1], 0 }
   0x4   :  { %13 = vsyncpa [#allocation4], 0 }
   0x5   :  { %15 = vsyncpa [#allocation4 + $0x1], 0  ;;  %s808_s9 = smov 0   ;;  %s810_s10 = smov 0  }
   0x6   :  { %s812_s11 = smov 0   ;;  %s814_s12 = smov 0  }
   0x7   :  { %s816_s13 = smov 0   ;;  %s818_s14 = smov 0  }
   0x8 LB: > { %s542_s15 = sadd.s32 4294967295, %s786_s14   ;;  %s543_s16 = sadd.s32 4294967294, %s786_s14   ;;  %s786_s14 = sphi %s818_s14, %s21_s14   ;;  %s782_s13 = sphi %s816_s13, %s1067_s13   ;;  %s778_s12 = sphi %s814_s12, %s1066_s12   ;;  %s774_s11 = sphi %s812_s11, %s1065_s11   ;;  %s770_s10 = sphi %s810_s10, %s1064_s10   ;;  %s766_s9 = sphi %s808_s9, %s1063_s9  }
   0x9   : > { %s40_s17 = sadd.s32 1, %s782_s13  ;;  %s55_s18 = sadd.s32 1, %s774_s11 }
   0xa   : > { %p42_p0 = scmp.ge.s32.totalorder %s40_s17, 2  ;;  %p62_p1 = scmp.ne.s32.totalorder %s774_s11, %s770_s10 }
   0xb   : > { %p63_p2 = scmp.eq.s32.totalorder %s786_s14, 0  ;;  %p68_p3 = scmp.ne.s32.totalorder %s770_s10, %s766_s9 }
   0xc   : > { %s1069_s17 = smov (%p42_p0, %s40_s17), 0  ;;  %p69_p5 = scmp.eq.s32.totalorder %s542_s15, 0 }
   0xd   : > { %p849_p4 = por %p63_p2, %p62_p1  ;;  %s50_s20 = ssub.s32 %s782_s13, %s1069_s17 }
   0xe   : > { %p128_p6 = scmp.eq.s32.totalorder %s542_s15, 1  ;;  %p53_p7 = scmp.eq.s32.totalorder %s50_s20, 0 }
   0xf   : > { %p855_p8 = por %p69_p5, %p68_p3  ;;  %p134_p10 = scmp.eq.s32.totalorder %s543_s16, 1 }
  0x10   : > { %p859_p9 = por %p128_p6, %p62_p1  ;;  %p581_p13 = scmp.lt.s32.totalorder %s786_s14, 2 }
  0x11   : > { %s1049_s21 = scalar_select %p855_p8, 1, 0 }
  0x12   : > { %s1050_s22 = scalar_select %p859_p9, 1, 0 }
  0x13   : > { %s864_s23 = scalar_select %p53_p7, %s774_s11, %s55_s18  }
  0x14   : > { %p866_p11 = por %p134_p10, %p68_p3  ;;  %s873_s25 = sand.u32 1, %s774_s11  }
  0x15   : > { %s546_s26 = sshll.u32 %s873_s25, 3  ;;  %s561_s27 = sshll.u32 %s782_s13, 7 }
  0x16   : > { %s1051_s24 = scalar_select %p866_p11, 1, 0 }
  0x17   : > { %s880_s30 = scalar_lea.hbm %s1043_s0, %s561_s27  ;;  %s158_s3 = scalar_lea.vmem [#allocation2], %s546_s26 }
  0x18   : > { %s171_s4 = sshll.u32 %s158_s3, 4  ;;  %p886_p0 = pnand %p581_p13, %p849_p4  ;;  %s882_s4 = int_to_ptr.vmem [resolvable:$true] %s171_s4 }
  0x19   : > { %s155_s6 = scalar_lea.sflag [#allocation3], %s873_s25  ;;  %s640_s7 = scalar_lea.hbm %s880_s30, 128 }
  0x1a   : > { %p641_p3 = scmp.ne.s32.totalorder %s880_s30, %s640_s7  ;;  %p642_p5 = pneg %p886_p0 }
  0x1b   : > { %s645_s16 = scalar_lea.hbm %s1043_s0, 256  ;;  %p646_p4 = scmp.lt.u32.totalorder %s880_s30, %s1043_s0 }
  0x1c   : > { %p643_p6 = pnand %p642_p5, %p641_p3  ;;  %p647_p10 = scmp.lt.u32.totalorder %s645_s16, %s640_s7 }
  0x1d   : > { %p649_p12 = scmp.lt.u32.totalorder %s640_s7, %s880_s30 }
  0x1e   : > { %p644_p7 = pneg %p643_p6  ;;  %p648_p13 = por %p647_p10, %p646_p4 }
  0x20   : > { %p650_p1 = por %p649_p12, %p648_p13 }
  0x22   : > { %p651_p2 = pnand %p650_p1, %p644_p7 }
  0x24   : > { %654 = shalt.err (!%p651_p2)
}
  0x25   : > { %s655_s20 = scalar_lea.vmem %s882_s4, 128  ;;  %s788_s26 = smov [#allocation2]  }
  0x26   : > { %p656_p3 = scmp.ne.s32.totalorder %s882_s4, %s655_s20  ;;  %s660_s27 = sshll.u32 %s788_s26, 4  ;;  %s661_s27 = int_to_ptr.vmem [resolvable:$false] %s660_s27 }
  0x27   : > { %s662_s28 = scalar_lea.vmem %s661_s27, 256  ;;  %p663_p9 = scmp.lt.s32.totalorder %s882_s4, %s661_s27 }
  0x28   : > { %p658_p6 = pnand %p656_p3, %p642_p5  ;;  %p664_p4 = scmp.lt.s32.totalorder %s662_s28, %s655_s20 }
  0x2a   : > { %p659_p11 = pneg %p658_p6  ;;  %p665_p10 = por %p664_p4, %p663_p9 }
  0x2c   : > { %p666_p12 = pnand %p665_p10, %p659_p11 }
  0x2e   : > { %669 = shalt.err (!%p666_p12)
}
  0x2f   : > { %573 = dma.hbm_to_vmem [thread:$0]  (!%p886_p0), %s880_s30, 128, %s882_s4, %s155_s6  }
  0x30   : > { %p1053_p1 = scmp.lt.s32.totalorder %s786_s14, 3  ;;  %p1054_p2 = scmp.ge.s32.totalorder %s786_s14, 1 }
  0x31   : > { %s549_s3 = sshll.u32 %s873_s25, 1  ;;  %s562_s7 = sshll.u32 %s782_s13, 5 }
  0x32   : > { %p922_p7 = pnand %p1054_p2, %p1053_p1  ;;  %s931_s16 = scalar_lea.hbm %s1044_s1, %s562_s7 }
  0x33   : > { %s182_s18 = scalar_lea.vmem [#allocation5], %s549_s3  ;;  %s179_s30 = scalar_lea.sflag [#allocation6], %s873_s25 }
  0x34   : > { %s1055_s29 = scalar_select %p922_p7, 1, 0 }
  0x35   : > { %s195_s19 = sshll.u32 %s182_s18, 4  ;;  %s670_s4 = scalar_lea.hbm %s931_s16, 32  ;;  %s196_s19 = int_to_ptr.vmem [resolvable:$true] %s195_s19 }
  0x36   : > { %p671_p9 = scmp.ne.s32.totalorder %s931_s16, %s670_s4  ;;  %s675_s26 = scalar_lea.hbm %s1044_s1, 64 }
  0x37   : > { %p676_p3 = scmp.lt.u32.totalorder %s931_s16, %s1044_s1  ;;  %p677_p6 = scmp.lt.u32.totalorder %s675_s26, %s670_s4 }
  0x38   : > { %p673_p11 = pnand %p671_p9, %p642_p5  ;;  %p679_p10 = scmp.lt.u32.totalorder %s670_s4, %s931_s16 }
  0x39   : > { %p678_p4 = por %p677_p6, %p676_p3 }
  0x3a   : > { %p674_p13 = pneg %p673_p11 }
  0x3b   : > { %p680_p12 = por %p679_p10, %p678_p4 }
  0x3d   : > { %p681_p1 = pnand %p680_p12, %p674_p13 }
  0x3f   : > { %684 = shalt.err (!%p681_p1)
}
  0x40   : > { %s685_s25 = scalar_lea.vmem %s196_s19, 32  ;;  %s789_s3 = smov [#allocation5]  }
  0x41   : > { %p686_p2 = scmp.ne.s32.totalorder %s196_s19, %s685_s25  ;;  %s690_s7 = sshll.u32 %s789_s3, 4  ;;  %s691_s7 = int_to_ptr.vmem [resolvable:$false] %s690_s7 }
  0x42   : > { %s692_s8 = scalar_lea.vmem %s691_s7, 64  ;;  %p693_p8 = scmp.lt.s32.totalorder %s196_s19, %s691_s7 }
  0x43   : > { %p688_p9 = pnand %p686_p2, %p642_p5  ;;  %p694_p7 = scmp.lt.s32.totalorder %s692_s8, %s685_s25 }
  0x45   : > { %p689_p11 = pneg %p688_p9  ;;  %p695_p3 = por %p694_p7, %p693_p8 }
  0x47   : > { %p696_p6 = pnand %p695_p3, %p689_p11 }
  0x49   : > { %699 = shalt.err (!%p696_p6)
}
  0x4a   : > { %576 = dma.hbm_to_vmem [thread:$0]  (!%p886_p0), %s931_s16, 32, %s196_s19, %s179_s30  }
  0x4b   : > { %p1056_p13 = scmp.ne.s32.totalorder %s1055_s29, 0 }
  0x4c   : > { %s956_s15 = sand.u32 (!%p1056_p13), 1, %s770_s10   ;;  %p1057_p5 = scmp.ne.s32.totalorder (!%p1056_p13), %s1049_s21, 0 }
  0x4d   : > { %204 = sbr.rel (%p1056_p13) target bundleno = 175 (0xaf), region = 28  ;;  %s553_s18 = sshll.u32 (!%p1056_p13), %s956_s15, 3 }
  0x4e   : > { %s207_s4 = scalar_lea.sflag (!%p1056_p13), [#allocation3], %s956_s15  ;;  %s210_s6 = scalar_lea.vmem (!%p1056_p13), [#allocation2], %s553_s18 }
  0x54   : > { %753 = dma.done.wait (%p1057_p5), %s207_s4, 128  }
  0x55   : > { %755 = vsyncadd (%p1057_p5), %s207_s4, 4294967168  ;;  %s554_s5 = sshll.u32 %s956_s15, 1  ;;  %s216_s29 = scalar_lea.sflag [#allocation6], %s956_s15 }
  0x56   : > { %s219_s16 = scalar_lea.vmem [#allocation5], %s554_s5 }
  0x57   : > { %757 = dma.done.wait (%p1057_p5), %s216_s29, 32  }
  0x58   : > { %759 = vsyncadd (%p1057_p5), %s216_s29, 4294967264  ;;  %v258_v0 = vlaneseq  ;;  %s974_s19 = scalar_lea.vmem [#allocation7], %s554_s5  ;;  %v790_v2 = vmov 0.0   ;;  %vm268_vm1 = vcmask 1043456   ;;  %v263_v3 = vld [vmem:[%s210_s6] sm:$0xff]  ;;  %s563_s21 = sshll.u32 %s778_s12, 5 }
  0x59   : > { %v266_v4 = vcombine.high %v263_v3, %v263_v3  ;;  %v269_v5 = vsel %vm268_vm1, %v263_v3, -inf  ;;  %v264_v24 = vld [vmem:[%s219_s16] sm:$0x3]  ;;  %v791_v58 = vmov 1966171168   ;;  %s429_s30 = sshll.u32 %s974_s19, 4  ;;  %s991_s27 = scalar_lea.hbm %s1045_s2, %s563_s21  ;;  %s993_s30 = int_to_ptr.vmem [resolvable:$true] %s429_s30 }
  0x5a   : > { %vm970_vm0 = vcmp.lt.s32.totalorder %v258_v0, 256  ;;  %v270_v6 = vrot.slane %v269_v5, 4  ;;  %v314_v20 = vshrl.u32 %v258_v0, 7  ;;  %v352_v59 = vunpack.c.l.s4 %v791_v58  ;;  %s413_s28 = scalar_lea.sflag [#allocation4], %s956_s15  ;;  %s700_s25 = scalar_lea.vmem %s993_s30, 32 }
  0x5b   : > { %262 = vst.msk [vmem:[%s974_s19] sm:$0x3] %vm970_vm0, %v790_v2  ;;  %v276_v7 = vsel %vm268_vm1, %v266_v4, -inf  ;;  %p701_p8 = scmp.ne.s32.totalorder %s993_s30, %s700_s25  ;;  %p1060_p0 = scmp.ne.s32.totalorder %s1050_s22, 0 }
  0x5c   : > { %v271_v8 = vmax.f32 %v269_v5, %v270_v6  ;;  %v277_v9 = vrot.slane %v276_v7, 4  ;;  %v317_v23 = vsub.s32 0, %v314_v20  ;;  %v321_v25 = vsub.s32 1, %v314_v20  ;;  %s792_s12 = smov [#allocation7]  }
  0x5d   : > { %p702_p7 = pnand %p701_p8, %p1060_p0  ;;  %s704_s3 = sshll.u32 %s792_s12, 4  ;;  %s705_s3 = int_to_ptr.vmem [resolvable:$false] %s704_s3 }
  0x5e   : > { %v272_v10 = vrot.slane %v271_v8, 2  ;;  %v278_v11 = vmax.f32 %v276_v7, %v277_v9  ;;  %v318_v26 = vrot.slane %v264_v24, %v317_v23  ;;  %v322_v27 = vrot.slane %v264_v24, %v321_v25  ;;  %s706_s7 = scalar_lea.vmem %s705_s3, 64  ;;  %p707_p10 = scmp.lt.s32.totalorder %s993_s30, %s705_s3 }
  0x5f   : > { %p703_p4 = pneg %p702_p7  ;;  %p708_p12 = scmp.lt.s32.totalorder %s706_s7, %s700_s25 }
  0x60   : > { %v273_v12 = vmax.f32 %v271_v8, %v272_v10  ;;  %v279_v13 = vrot.slane %v278_v11, 2  ;;  %vm323_vm2 = vcmp.eq.s32.totalorder %v314_v20, %v318_v26  ;;  %vm324_vm3 = vcmp.eq.s32.totalorder %v314_v20, %v322_v27 }
  0x61   : > { %v325_v28 = vsel %vm323_vm2, %v263_v3, 0.0  ;;  %v326_v32 = vsel %vm324_vm3, %v266_v4, 0.0  ;;  %v353_v4 = vunpack.c.0.s8 %v352_v59  ;;  %p709_p1 = por %p708_p12, %p707_p10 }
  0x62   : > { %v274_v14 = vrot.slane %v273_v12, 1  ;;  %v280_v15 = vmax.f32 %v278_v11, %v279_v13  ;;  %v327_v34 = vsel %vm268_vm1, %v325_v28, 0.0  ;;  %v334_v38 = vsel %vm268_vm1, %v326_v32, 0.0  ;;  %v347_v11 = vld [vmem:[%s974_s19] sm:$0x3] }
  0x63   : > { %v328_v39 = vrot.slane %v327_v34, 4  ;;  %v335_v42 = vrot.slane %v334_v38, 4  ;;  %v356_v8 = vsub.s32 %v353_v4, %v314_v20  ;;  %p710_p2 = pnand %p709_p1, %p703_p4 }
  0x64   : > { %v275_v16 = vmax.f32 %v273_v12, %v274_v14  ;;  %v281_v17 = vrot.slane %v280_v15, 1 }
  0x65   : > { %v329_v45 = vadd.f32 %v328_v39, %v327_v34  ;;  %v336_v48 = vadd.f32 %v335_v42, %v334_v38 }
  0x66   : > { %v282_v18 = vmax.f32 %v280_v15, %v281_v17 }
  0x67   : > { %v330_v51 = vrot.slane %v329_v45, 2  ;;  %v337_v53 = vrot.slane %v336_v48, 2 }
  0x68   : > { %v285_v19 = vcombine.low %v275_v16, %v282_v18 }
  0x69   : > { %v331_v54 = vadd.f32 %v330_v51, %v329_v45  ;;  %v338_v55 = vadd.f32 %v337_v53, %v336_v48 }
  0x6a   : > { %v287_v21 = vsub.f32 %v263_v3, %v285_v19 }
  0x6b   : > { %v332_v56 = vrot.slane %v331_v54, 1  ;;  %v339_v57 = vrot.slane %v338_v55, 1 }
  0x6c   : > { %v288_v22 = vmul.f32 1.442695, %v287_v21 }
  0x6d   : > { %v333_v62 = vadd.f32 %v332_v56, %v331_v54  ;;  %v340_v3 = vadd.f32 %v339_v57, %v338_v55 }
  0x6e   : > { %634 = vpow2.f32 %v288_v22 }
  0x78   : > { %v635_v29 = vpop.eup %634 }
  0x79   : > { %v291_v30 = vcombine.high %v635_v29, %v635_v29  ;;  %v293_v31 = vsel %vm268_vm1, %v635_v29, 0.0 }
  0x7a   : > { %v294_v33 = vrot.slane %v293_v31, 4 }
  0x7b   : > { %v300_v35 = vsel %vm268_vm1, %v291_v30, 0.0 }
  0x7c   : > { %v295_v36 = vadd.f32 %v294_v33, %v293_v31  ;;  %v301_v37 = vrot.slane %v300_v35, 4 }
  0x7e   : > { %v296_v40 = vrot.slane %v295_v36, 2  ;;  %v302_v41 = vadd.f32 %v301_v37, %v300_v35 }
  0x80   : > { %v297_v43 = vadd.f32 %v296_v40, %v295_v36  ;;  %v303_v44 = vrot.slane %v302_v41, 2 }
  0x82   : > { %v298_v46 = vrot.slane %v297_v43, 1  ;;  %v304_v47 = vadd.f32 %v303_v44, %v302_v41 }
  0x84   : > { %v299_v49 = vadd.f32 %v298_v46, %v297_v43  ;;  %v305_v50 = vrot.slane %v304_v47, 1 }
  0x86   : > { %v306_v52 = vadd.f32 %v305_v50, %v304_v47  ;;  %636 = vlog2.f32 %v299_v49 }
  0x88   : > { %638 = vlog2.f32 %v306_v52 }
  0x90   : > { %v637_v60 = vpop.eup %636 }
  0x91   : > { %v308_v61 = vmul.f32 0.6931472, %v637_v60 }
  0x92   : > { %v639_v63 = vpop.eup %638 }
  0x93   : > { %v310_v0 = vmul.f32 0.6931472, %v639_v63  ;;  %v311_v2 = vadd.f32 %v308_v61, %v275_v16 }
  0x95   : > { %v312_v5 = vadd.f32 %v310_v0, %v282_v18  ;;  %v341_v6 = vsub.f32 %v311_v2, %v333_v62 }
  0x97   : > { %v342_v7 = vsub.f32 %v312_v5, %v340_v3 }
  0x99   : > { %v350_v9 = vcombine.low %v341_v6, %v342_v7 }
  0x9b   : > { %v357_v10 = vrot.slane %v350_v9, %v356_v8 }
  0x9d   : > { %v364_v12 = vrot.slane %v357_v10, %v356_v8 }
  0x9f   : > { %v366_v13 = vadd.f32 %v364_v12, %v347_v11 }
  0xa1   : > { %371 = vst.msk [vmem:[%s974_s19] sm:$0x3] %vm970_vm0, %v366_v13 }
  0xa2   : > { %713 = shalt.err (!%p710_p2)
}
  0xa3   : > { %s714_s8 = scalar_lea.hbm %s991_s27, 32  ;;  %s718_s4 = scalar_lea.hbm %s1045_s2, 64 }
  0xa4   : > { %p715_p9 = scmp.ne.s32.totalorder %s991_s27, %s714_s8  ;;  %p719_p6 = scmp.lt.u32.totalorder %s991_s27, %s1045_s2 }
  0xa5   : > { %p720_p13 = scmp.lt.u32.totalorder %s718_s4, %s714_s8  ;;  %p722_p8 = scmp.lt.u32.totalorder %s714_s8, %s991_s27 }
  0xa6   : > { %p716_p11 = pnand %p715_p9, %p1060_p0 }
  0xa7   : > { %p721_p5 = por %p720_p13, %p719_p6 }
  0xa8   : > { %p717_p3 = pneg %p716_p11 }
  0xa9   : > { %p723_p7 = por %p722_p8, %p721_p5 }
  0xab   : > { %p724_p4 = pnand %p723_p7, %p717_p3 }
  0xad   : > { %727 = shalt.err (!%p724_p4)
}
  0xae   : > { %568 = dma.vmem_to_hbm [thread:$0]  (%p1060_p0), %s993_s30, 32, %s991_s27, %s413_s28  }
  0xaf PF: > { %s441_s29 = sand.u32 1, %s766_s9   ;;  %p1061_p10 = scmp.ne.s32.totalorder %s1051_s24, 0 }
  0xb0   : > { %p1062_p12 = scmp.ge.s32.totalorder %s786_s14, 2  ;;  %s442_s16 = scalar_lea.sflag [#allocation4], %s441_s29 }
  0xb2   : > { %p578_p1 = pnand %p1062_p12, %p1061_p10 }
  0xb4   : > { %761 = dma.done.wait (!%p578_p1), %s442_s16, 32  }
  0xb5   : > { %763 = vsyncadd (!%p578_p1), %s442_s16, 4294967264  ;;  %s21_s14 = sadd.s32 1, %s786_s14   ;;  %s1063_s9 = smov %s770_s10 }
  0xb6   : > { %p18_p2 = scmp.ge.s32.totalorder %s21_s14, 4   ;;  %s1064_s10 = smov %s774_s11 }
  0xb7   : > { %s1065_s11 = smov %s864_s23  ;;  %s1066_s12 = smov %s782_s13 }
  0xb8   : > { %s1067_s13 = smov %s1069_s17  ;;  %20 = sbr.rel (!%p18_p2) target bundleno = 8 (0x8), region = 98 }
  0xbf   :  { %447 = vsyncpa [#allocation3], 1 }
  0xc0   :  { %449 = vsyncpa [#allocation3 + $0x1], 1 }
  0xc1   :  { %450 = vsyncpa [#allocation6], 1 }
  0xc2   :  { %452 = vsyncpa [#allocation6 + $0x1], 1 }
  0xc3   :  { %453 = vsyncpa [#allocation4], 1 }
  0xc4   :  { %455 = vsyncpa [#allocation4 + $0x1], 1 }

</bundles_post_ra>
